<compile_context>
chip_gen: v6e
topology: v6e:2x2x1
jax: 0.10.0
libtpu: 0.0.40
codegen_flags: <defaults>
</compile_context>

<pallas_src>
import jax
import jax.numpy as jnp
from jax.experimental import pallas as pl
from jax.experimental.pallas import tpu as pltpu

IN_F, HID_F, OUT_F = 1, 3, 5
SUBLANES = 8              # batch rows per vreg (sublane axis)
LANE = 128                # lane tile granularity
TILE_L_MAX = 16384        # max lanes per grid step (= 131072 samples/step)

# Packed parameter layout (flat f32 buffer in SMEM).
W1_OFF = 0
B1_OFF = W1_OFF + HID_F                  # 3
W2_OFF = B1_OFF + HID_F                  # 6   (row-major: w2[k, j] at k*HID_F + j)
B2_OFF = W2_OFF + OUT_F * HID_F          # 21
N_PARAMS = B2_OFF + OUT_F                # 26
PARAM_PAD = 32


def _round_up(n, m):
    return ((n + m - 1) // m) * m


def _generator_kernel(params_ref, x_ref, o_ref):
    # params_ref: (PARAM_PAD,) f32 in SMEM  -- scalar parameters
    # x_ref     : (8, tile_l) f32 in VMEM   -- one sample per (sublane, lane)
    # o_ref     : (OUT_F, 8, tile_l) f32    -- one dense plane per output feature
    x = x_ref[...]  # (8, tile_l)

    # Layer 1: Linear(1 -> 3) + Sigmoid  ==  3 broadcast FMAs + EUP sigmoid.
    h = [
        jax.nn.sigmoid(params_ref[W1_OFF + j] * x + params_ref[B1_OFF + j])
        for j in range(HID_F)
    ]

    # Layer 2: Linear(3 -> 5) + Sigmoid  ==  15 broadcast FMAs + EUP sigmoid.
    # Each output feature is stored as a full dense (8, tile_l) plane.
    for k in range(OUT_F):
        acc = params_ref[W2_OFF + k * HID_F] * h[0] + params_ref[B2_OFF + k]
        for j in range(1, HID_F):
            acc = acc + params_ref[W2_OFF + k * HID_F + j] * h[j]
        o_ref[k] = jax.nn.sigmoid(acc)


def pack_params(w1, b1, w2, b2):
    """Pack PyTorch-layout params (w1:(3,1), b1:(3,), w2:(5,3), b2:(5,)) into a
    flat f32[32] buffer.  Call once; reuse across forward calls."""
    p = jnp.zeros((PARAM_PAD,), jnp.float32)
    p = p.at[W1_OFF:W1_OFF + HID_F].set(jnp.asarray(w1, jnp.float32).reshape(-1))
    p = p.at[B1_OFF:B1_OFF + HID_F].set(jnp.asarray(b1, jnp.float32).reshape(-1))
    p = p.at[W2_OFF:W2_OFF + OUT_F * HID_F].set(
        jnp.asarray(w2, jnp.float32).reshape(-1))
    p = p.at[B2_OFF:B2_OFF + OUT_F].set(jnp.asarray(b2, jnp.float32).reshape(-1))
    return p


def _choose_tile_l(L):
    """Lanes per grid step.  Single full-array block for small L; otherwise a
    128-aligned tile capped at TILE_L_MAX and at ~L/2 so the parallel grid has
    at least 2 steps (lets v7x shard across both TensorCores)."""
    if L < 2 * LANE:
        return L
    half = -(-L // 2)  # cdiv(L, 2)
    return min(TILE_L_MAX, _round_up(half, LANE))


@jax.jit
def generator_forward(x, packed_params):
    """x: (B, 1) float32, packed_params: (32,) float32. Returns (B, 5) float32."""
    B = x.shape[0]
    xf = jnp.reshape(x, (B,)).astype(jnp.float32)

    # Pad batch only to a multiple of 8 (<= 7 extra samples; skipped if aligned),
    # then a free contiguous reshape puts the batch on (sublane, lane).
    B8 = _round_up(B, SUBLANES)
    if B8 != B:
        xf = jnp.pad(xf, (0, B8 - B))
    L = B8 // SUBLANES
    x2d = xf.reshape(SUBLANES, L)          # sample s at [s // L, s % L]

    tile_l = _choose_tile_l(L)
    grid = (pl.cdiv(L, tile_l),)

    out_t = pl.pallas_call(
        _generator_kernel,
        out_shape=jax.ShapeDtypeStruct((OUT_F, SUBLANES, L), jnp.float32),
        grid_spec=pltpu.PrefetchScalarGridSpec(
            num_scalar_prefetch=0,
            grid=grid,
            in_specs=[
                # Tiny parameter buffer: whole array, resident in SMEM.
                pl.BlockSpec(memory_space=pltpu.MemorySpace.SMEM),
                # Input samples: sublane-dense, tiled along the lane axis.
                pl.BlockSpec((SUBLANES, tile_l), lambda i: (0, i)),
            ],
            out_specs=pl.BlockSpec(
                (OUT_F, SUBLANES, tile_l), lambda i: (0, 0, i)),
        ),
        compiler_params=pltpu.CompilerParams(
            dimension_semantics=("parallel",),
        ),
    )(packed_params, x2d)

    # Kernel-native layout is (5, 8, L) == feature-major (5, B8) after a free
    # contiguous reshape; the module spec requires (B, 5), so one small
    # slice+transpose at the interface (consumers that accept feature-major
    # data should skip this).
    return out_t.reshape(OUT_F, B8)[:, :B].T


def init_params(key):
    """Deterministic init mimicking PyTorch nn.Linear default U(-1/sqrt(fan_in), +)."""
    k1, k2, k3, k4 = jax.random.split(key, 4)
    bound1 = 1.0 / (IN_F ** 0.5)
    bound2 = 1.0 / (HID_F ** 0.5)
    w1 = jax.random.uniform(k1, (HID_F, IN_F), jnp.float32, -bound1, bound1)
    b1 = jax.random.uniform(k2, (HID_F,), jnp.float32, -bound1, bound1)
    w2 = jax.random.uniform(k3, (OUT_F, HID_F), jnp.float32, -bound2, bound2)
    b2 = jax.random.uniform(k4, (OUT_F,), jnp.float32, -bound2, bound2)
    return w1, b1, w2, b2


def _reference(x, w1, b1, w2, b2):
    h = jax.nn.sigmoid(x @ w1.T + b1)
    return jax.nn.sigmoid(h @ w2.T + b2)


# TODO(synk): training loop / SGD optimiser / plotting / state-dict I/O of the
# PyTorch module are not part of the forward pass and are not implemented.

if __name__ == "__main__":
    key = jax.random.PRNGKey(0)
    pk, xk1, xk2 = jax.random.split(key, 3)
    w1, b1, w2, b2 = init_params(pk)
    params = pack_params(w1, b1, w2, b2)  # packed once, reused per call

    # Small batch (multiple of 8: no pad, single full-array block).
    B = 8
    x = jax.random.normal(xk1, (B, IN_F), jnp.float32)
    out = jax.block_until_ready(generator_forward(x, params))
    ref = _reference(x, w1, b1, w2, b2)
    assert out.shape == (B, OUT_F)
    assert jnp.allclose(out, ref, atol=1e-5, rtol=1e-5)

    # Non-multiple-of-8 batch is also covered by the formula (pads to 200? no:
    # 200 % 8 == 0) -- use 203 to exercise the <=7-sample pad path too.
    B2 = 203
    x2 = jax.random.normal(xk2, (B2, IN_F), jnp.float32)
    out2 = jax.block_until_ready(generator_forward(x2, params))
    ref2 = _reference(x2, w1, b1, w2, b2)
    assert out2.shape == (B2, OUT_F)
    assert jnp.allclose(out2, ref2, atol=1e-5, rtol=1e-5)

    print("KERNEL_OK")
</pallas_src>

<mosaic_0001>
module attributes {stable_mosaic.version = 11 : i64} {
  func.func @_generator_kernel(%arg0: i32, %arg1: memref<32xf32, #tpu.memory_space<smem>>, %arg2: memref<8x1xf32, #tpu.memory_space<vmem>>, %arg3: memref<5x8x1xf32, #tpu.memory_space<vmem>>) attributes {dimension_semantics = [#tpu.dimension_semantics<parallel>], iteration_bounds = array<i64: 1>, scalar_prefetch = 0 : i64, scratch_operands = 0 : i64, tpu.core_type = #tpu.core_type<tc>, window_params = [{transform_indices = @transform_0, window_bounds = array<i64: 32>}, {transform_indices = @transform_1, window_bounds = array<i64: 8, 1>}, {transform_indices = @transform_2, window_bounds = array<i64: 5, 8, 1>}]} {
    %c0 = arith.constant 0 : index
    %c0_0 = arith.constant 0 : index
    %0 = vector.load %arg2[%c0, %c0_0] : memref<8x1xf32, #tpu.memory_space<vmem>>, vector<8x1xf32>
    %c0_1 = arith.constant 0 : index
    %1 = memref.load %arg1[%c0_1] : memref<32xf32, #tpu.memory_space<smem>>
    %2 = vector.broadcast %1 : f32 to vector<8x1xf32>
    %3 = arith.mulf %2, %0 : vector<8x1xf32>
    %c3 = arith.constant 3 : index
    %4 = memref.load %arg1[%c3] : memref<32xf32, #tpu.memory_space<smem>>
    %5 = vector.broadcast %4 : f32 to vector<8x1xf32>
    %6 = arith.addf %3, %5 : vector<8x1xf32>
    %7 = arith.negf %6 : vector<8x1xf32>
    %8 = math.exp %7 : vector<8x1xf32>
    %cst = arith.constant 1.000000e+00 : f32
    %9 = vector.broadcast %cst : f32 to vector<8x1xf32>
    %10 = arith.addf %9, %8 : vector<8x1xf32>
    %11 = arith.divf %9, %10 : vector<8x1xf32>
    %c1 = arith.constant 1 : index
    %12 = memref.load %arg1[%c1] : memref<32xf32, #tpu.memory_space<smem>>
    %13 = vector.broadcast %12 : f32 to vector<8x1xf32>
    %14 = arith.mulf %13, %0 : vector<8x1xf32>
    %c4 = arith.constant 4 : index
    %15 = memref.load %arg1[%c4] : memref<32xf32, #tpu.memory_space<smem>>
    %16 = vector.broadcast %15 : f32 to vector<8x1xf32>
    %17 = arith.addf %14, %16 : vector<8x1xf32>
    %18 = arith.negf %17 : vector<8x1xf32>
    %19 = math.exp %18 : vector<8x1xf32>
    %cst_2 = arith.constant 1.000000e+00 : f32
    %20 = vector.broadcast %cst_2 : f32 to vector<8x1xf32>
    %21 = arith.addf %20, %19 : vector<8x1xf32>
    %22 = arith.divf %20, %21 : vector<8x1xf32>
    %c2 = arith.constant 2 : index
    %23 = memref.load %arg1[%c2] : memref<32xf32, #tpu.memory_space<smem>>
    %24 = vector.broadcast %23 : f32 to vector<8x1xf32>
    %25 = arith.mulf %24, %0 : vector<8x1xf32>
    %c5 = arith.constant 5 : index
    %26 = memref.load %arg1[%c5] : memref<32xf32, #tpu.memory_space<smem>>
    %27 = vector.broadcast %26 : f32 to vector<8x1xf32>
    %28 = arith.addf %25, %27 : vector<8x1xf32>
    %29 = arith.negf %28 : vector<8x1xf32>
    %30 = math.exp %29 : vector<8x1xf32>
    %cst_3 = arith.constant 1.000000e+00 : f32
    %31 = vector.broadcast %cst_3 : f32 to vector<8x1xf32>
    %32 = arith.addf %31, %30 : vector<8x1xf32>
    %33 = arith.divf %31, %32 : vector<8x1xf32>
    %c6 = arith.constant 6 : index
    %34 = memref.load %arg1[%c6] : memref<32xf32, #tpu.memory_space<smem>>
    %35 = vector.broadcast %34 : f32 to vector<8x1xf32>
    %36 = arith.mulf %35, %11 : vector<8x1xf32>
    %c21 = arith.constant 21 : index
    %37 = memref.load %arg1[%c21] : memref<32xf32, #tpu.memory_space<smem>>
    %38 = vector.broadcast %37 : f32 to vector<8x1xf32>
    %39 = arith.addf %36, %38 : vector<8x1xf32>
    %c7 = arith.constant 7 : index
    %40 = memref.load %arg1[%c7] : memref<32xf32, #tpu.memory_space<smem>>
    %41 = vector.broadcast %40 : f32 to vector<8x1xf32>
    %42 = arith.mulf %41, %22 : vector<8x1xf32>
    %43 = arith.addf %39, %42 : vector<8x1xf32>
    %c8 = arith.constant 8 : index
    %44 = memref.load %arg1[%c8] : memref<32xf32, #tpu.memory_space<smem>>
    %45 = vector.broadcast %44 : f32 to vector<8x1xf32>
    %46 = arith.mulf %45, %33 : vector<8x1xf32>
    %47 = arith.addf %43, %46 : vector<8x1xf32>
    %48 = arith.negf %47 : vector<8x1xf32>
    %49 = math.exp %48 : vector<8x1xf32>
    %cst_4 = arith.constant 1.000000e+00 : f32
    %50 = vector.broadcast %cst_4 : f32 to vector<8x1xf32>
    %51 = arith.addf %50, %49 : vector<8x1xf32>
    %52 = arith.divf %50, %51 : vector<8x1xf32>
    %c0_5 = arith.constant 0 : index
    %c0_6 = arith.constant 0 : index
    %c0_7 = arith.constant 0 : index
    %53 = vector.load %arg3[%c0_5, %c0_6, %c0_7] : memref<5x8x1xf32, #tpu.memory_space<vmem>>, vector<1x8x1xf32>
    %54 = vector.shape_cast %53 : vector<1x8x1xf32> to vector<8x1xf32>
    %55 = vector.shape_cast %52 : vector<8x1xf32> to vector<1x8x1xf32>
    tpu.vector_store %arg3[%c0_5, %c0_6, %c0_7], %55 {strides = array<i32>} : memref<5x8x1xf32, #tpu.memory_space<vmem>>, vector<1x8x1xf32>,
    %c9 = arith.constant 9 : index
    %56 = memref.load %arg1[%c9] : memref<32xf32, #tpu.memory_space<smem>>
    %57 = vector.broadcast %56 : f32 to vector<8x1xf32>
    %58 = arith.mulf %57, %11 : vector<8x1xf32>
    %c22 = arith.constant 22 : index
    %59 = memref.load %arg1[%c22] : memref<32xf32, #tpu.memory_space<smem>>
    %60 = vector.broadcast %59 : f32 to vector<8x1xf32>
    %61 = arith.addf %58, %60 : vector<8x1xf32>
    %c10 = arith.constant 10 : index
    %62 = memref.load %arg1[%c10] : memref<32xf32, #tpu.memory_space<smem>>
    %63 = vector.broadcast %62 : f32 to vector<8x1xf32>
    %64 = arith.mulf %63, %22 : vector<8x1xf32>
    %65 = arith.addf %61, %64 : vector<8x1xf32>
    %c11 = arith.constant 11 : index
    %66 = memref.load %arg1[%c11] : memref<32xf32, #tpu.memory_space<smem>>
    %67 = vector.broadcast %66 : f32 to vector<8x1xf32>
    %68 = arith.mulf %67, %33 : vector<8x1xf32>
    %69 = arith.addf %65, %68 : vector<8x1xf32>
    %70 = arith.negf %69 : vector<8x1xf32>
    %71 = math.exp %70 : vector<8x1xf32>
    %cst_8 = arith.constant 1.000000e+00 : f32
    %72 = vector.broadcast %cst_8 : f32 to vector<8x1xf32>
    %73 = arith.addf %72, %71 : vector<8x1xf32>
    %74 = arith.divf %72, %73 : vector<8x1xf32>
    %c1_9 = arith.constant 1 : index
    %c0_10 = arith.constant 0 : index
    %c0_11 = arith.constant 0 : index
    %75 = vector.load %arg3[%c1_9, %c0_10, %c0_11] : memref<5x8x1xf32, #tpu.memory_space<vmem>>, vector<1x8x1xf32>
    %76 = vector.shape_cast %75 : vector<1x8x1xf32> to vector<8x1xf32>
    %77 = vector.shape_cast %74 : vector<8x1xf32> to vector<1x8x1xf32>
    tpu.vector_store %arg3[%c1_9, %c0_10, %c0_11], %77 {strides = array<i32>} : memref<5x8x1xf32, #tpu.memory_space<vmem>>, vector<1x8x1xf32>,
    %c12 = arith.constant 12 : index
    %78 = memref.load %arg1[%c12] : memref<32xf32, #tpu.memory_space<smem>>
    %79 = vector.broadcast %78 : f32 to vector<8x1xf32>
    %80 = arith.mulf %79, %11 : vector<8x1xf32>
    %c23 = arith.constant 23 : index
    %81 = memref.load %arg1[%c23] : memref<32xf32, #tpu.memory_space<smem>>
    %82 = vector.broadcast %81 : f32 to vector<8x1xf32>
    %83 = arith.addf %80, %82 : vector<8x1xf32>
    %c13 = arith.constant 13 : index
    %84 = memref.load %arg1[%c13] : memref<32xf32, #tpu.memory_space<smem>>
    %85 = vector.broadcast %84 : f32 to vector<8x1xf32>
    %86 = arith.mulf %85, %22 : vector<8x1xf32>
    %87 = arith.addf %83, %86 : vector<8x1xf32>
    %c14 = arith.constant 14 : index
    %88 = memref.load %arg1[%c14] : memref<32xf32, #tpu.memory_space<smem>>
    %89 = vector.broadcast %88 : f32 to vector<8x1xf32>
    %90 = arith.mulf %89, %33 : vector<8x1xf32>
    %91 = arith.addf %87, %90 : vector<8x1xf32>
    %92 = arith.negf %91 : vector<8x1xf32>
    %93 = math.exp %92 : vector<8x1xf32>
    %cst_12 = arith.constant 1.000000e+00 : f32
    %94 = vector.broadcast %cst_12 : f32 to vector<8x1xf32>
    %95 = arith.addf %94, %93 : vector<8x1xf32>
    %96 = arith.divf %94, %95 : vector<8x1xf32>
    %c2_13 = arith.constant 2 : index
    %c0_14 = arith.constant 0 : index
    %c0_15 = arith.constant 0 : index
    %97 = vector.load %arg3[%c2_13, %c0_14, %c0_15] : memref<5x8x1xf32, #tpu.memory_space<vmem>>, vector<1x8x1xf32>
    %98 = vector.shape_cast %97 : vector<1x8x1xf32> to vector<8x1xf32>
    %99 = vector.shape_cast %96 : vector<8x1xf32> to vector<1x8x1xf32>
    tpu.vector_store %arg3[%c2_13, %c0_14, %c0_15], %99 {strides = array<i32>} : memref<5x8x1xf32, #tpu.memory_space<vmem>>, vector<1x8x1xf32>,
    %c15 = arith.constant 15 : index
    %100 = memref.load %arg1[%c15] : memref<32xf32, #tpu.memory_space<smem>>
    %101 = vector.broadcast %100 : f32 to vector<8x1xf32>
    %102 = arith.mulf %101, %11 : vector<8x1xf32>
    %c24 = arith.constant 24 : index
    %103 = memref.load %arg1[%c24] : memref<32xf32, #tpu.memory_space<smem>>
    %104 = vector.broadcast %103 : f32 to vector<8x1xf32>
    %105 = arith.addf %102, %104 : vector<8x1xf32>
    %c16 = arith.constant 16 : index
    %106 = memref.load %arg1[%c16] : memref<32xf32, #tpu.memory_space<smem>>
    %107 = vector.broadcast %106 : f32 to vector<8x1xf32>
    %108 = arith.mulf %107, %22 : vector<8x1xf32>
    %109 = arith.addf %105, %108 : vector<8x1xf32>
    %c17 = arith.constant 17 : index
    %110 = memref.load %arg1[%c17] : memref<32xf32, #tpu.memory_space<smem>>
    %111 = vector.broadcast %110 : f32 to vector<8x1xf32>
    %112 = arith.mulf %111, %33 : vector<8x1xf32>
    %113 = arith.addf %109, %112 : vector<8x1xf32>
    %114 = arith.negf %113 : vector<8x1xf32>
    %115 = math.exp %114 : vector<8x1xf32>
    %cst_16 = arith.constant 1.000000e+00 : f32
    %116 = vector.broadcast %cst_16 : f32 to vector<8x1xf32>
    %117 = arith.addf %116, %115 : vector<8x1xf32>
    %118 = arith.divf %116, %117 : vector<8x1xf32>
    %c3_17 = arith.constant 3 : index
    %c0_18 = arith.constant 0 : index
    %c0_19 = arith.constant 0 : index
    %119 = vector.load %arg3[%c3_17, %c0_18, %c0_19] : memref<5x8x1xf32, #tpu.memory_space<vmem>>, vector<1x8x1xf32>
    %120 = vector.shape_cast %119 : vector<1x8x1xf32> to vector<8x1xf32>
    %121 = vector.shape_cast %118 : vector<8x1xf32> to vector<1x8x1xf32>
    tpu.vector_store %arg3[%c3_17, %c0_18, %c0_19], %121 {strides = array<i32>} : memref<5x8x1xf32, #tpu.memory_space<vmem>>, vector<1x8x1xf32>,
    %c18 = arith.constant 18 : index
    %122 = memref.load %arg1[%c18] : memref<32xf32, #tpu.memory_space<smem>>
    %123 = vector.broadcast %122 : f32 to vector<8x1xf32>
    %124 = arith.mulf %123, %11 : vector<8x1xf32>
    %c25 = arith.constant 25 : index
    %125 = memref.load %arg1[%c25] : memref<32xf32, #tpu.memory_space<smem>>
    %126 = vector.broadcast %125 : f32 to vector<8x1xf32>
    %127 = arith.addf %124, %126 : vector<8x1xf32>
    %c19 = arith.constant 19 : index
    %128 = memref.load %arg1[%c19] : memref<32xf32, #tpu.memory_space<smem>>
    %129 = vector.broadcast %128 : f32 to vector<8x1xf32>
    %130 = arith.mulf %129, %22 : vector<8x1xf32>
    %131 = arith.addf %127, %130 : vector<8x1xf32>
    %c20 = arith.constant 20 : index
    %132 = memref.load %arg1[%c20] : memref<32xf32, #tpu.memory_space<smem>>
    %133 = vector.broadcast %132 : f32 to vector<8x1xf32>
    %134 = arith.mulf %133, %33 : vector<8x1xf32>
    %135 = arith.addf %131, %134 : vector<8x1xf32>
    %136 = arith.negf %135 : vector<8x1xf32>
    %137 = math.exp %136 : vector<8x1xf32>
    %cst_20 = arith.constant 1.000000e+00 : f32
    %138 = vector.broadcast %cst_20 : f32 to vector<8x1xf32>
    %139 = arith.addf %138, %137 : vector<8x1xf32>
    %140 = arith.divf %138, %139 : vector<8x1xf32>
    %c4_21 = arith.constant 4 : index
    %c0_22 = arith.constant 0 : index
    %c0_23 = arith.constant 0 : index
    %141 = vector.load %arg3[%c4_21, %c0_22, %c0_23] : memref<5x8x1xf32, #tpu.memory_space<vmem>>, vector<1x8x1xf32>
    %142 = vector.shape_cast %141 : vector<1x8x1xf32> to vector<8x1xf32>
    %143 = vector.shape_cast %140 : vector<8x1xf32> to vector<1x8x1xf32>
    tpu.vector_store %arg3[%c4_21, %c0_22, %c0_23], %143 {strides = array<i32>} : memref<5x8x1xf32, #tpu.memory_space<vmem>>, vector<1x8x1xf32>,
    return
  }
  func.func @transform_0(%arg0: i32) -> i32 {
    %c0_i32 = arith.constant 0 : i32
    %c0_i32_0 = arith.constant 0 : i32
    return %c0_i32 : i32
  }
  func.func @transform_1(%arg0: i32) -> (i32, i32) {
    %c0_i32 = arith.constant 0 : i32
    %c0_i32_0 = arith.constant 0 : i32
    return %c0_i32, %arg0 : i32, i32
  }
  func.func @transform_2(%arg0: i32) -> (i32, i32, i32) {
    %c0_i32 = arith.constant 0 : i32
    %c0_i32_0 = arith.constant 0 : i32
    %c0_i32_1 = arith.constant 0 : i32
    return %c0_i32, %c0_i32_0, %arg0 : i32, i32, i32
  }
}

</mosaic_0001>

<bundles_post_ra>
// kernel: generator_forward.1
= control target key start
LH: loop header
LB: loop body
LE: loop exit
PB: predicated region body
PF: predicated region fallthrough
CT: control target
= control target key end

     0   :  { %7 = vsyncpa [#allocation3], 0  ;;  %s354_s0 = inlined_call_operand.vmem [shape: f32[32], index: 0, kind: input, shape index: {}]   ;;  %s355_s1 = inlined_call_operand.vmem [shape: f32[8,1], index: 1, kind: input, shape index: {}]   ;;  %s356_s2 = inlined_call_operand.vmem [shape: f32[5,8,1], index: 2, kind: output, shape index: {}]  }
   0x1   :  { %s14_s11 = sshll.u32 %s354_s0, 4  ;;  %s15_s11 = int_to_ptr.vmem [resolvable:$true] %s14_s11 }
   0x2   :  { %s246_s12 = scalar_lea.vmem %s15_s11, 16  ;;  %p251_p1 = scmp.lt.s32.totalorder %s15_s11, %s15_s11 }
   0x3   :  { %p247_p0 = scmp.ne.s32.totalorder %s15_s11, %s246_s12  ;;  %p252_p2 = scmp.lt.s32.totalorder %s246_s12, %s246_s12 }
   0x5   :  { %p253_p3 = por %p252_p2, %p251_p1 }
   0x7   :  { %p254_p4 = pnand %p253_p3, %p247_p0 }
   0x9   :  { %257 = shalt.err (!%p254_p4)
}
   0xa   :  { %s260_s13 = smov [#allocation2]  }
   0xb   :  { %17 = dma.vmem_to_smem %s15_s11, 16, %s260_s13, [#allocation3]  }
   0xc   :  { %258 = dma.done.wait [#allocation3], 16  }
   0xd   :  { %259 = vsyncadd [#allocation3], 4294967280 }
   0xe   :  { %23 = sfence }
   0xf   :  { %s25_s14 = sld [smem:[#allocation2]]  ;;  %v24_v0 = vld [vmem:[%s355_s1] sm:$0xff]  ;;  %vm81_vm0 = vcmask 7168  }
  0x10   :  { %s176_s15 = sld [smem:[#allocation2 + $0x3]] }
  0x11   :  { %s178_s16 = sld [smem:[#allocation2 + $0x1]] }
  0x12   :  { %s179_s17 = sld [smem:[#allocation2 + $0x4]] }
  0x13   :  { %s181_s0 = sld [smem:[#allocation2 + $0x2]] }
  0x14   :  { %s182_s20 = sld [smem:[#allocation2 + $0x5]] }
  0x15   :  { %v26_v1 = vstv %s25_s14  ;;  %s282_s1 = sld [smem:[#allocation2 + $0x6]] }
  0x16   :  { %v27_v2 = vmul.f32 %v26_v1, %v24_v0  ;;  %v29_v3 = vstv %s176_s15  ;;  %s284_s21 = sld [smem:[#allocation2 + $0x15]] }
  0x17   :  { %v38_v4 = vstv %s178_s16  ;;  %s286_s22 = sld [smem:[#allocation2 + $0x7]] }
  0x18   :  { %v30_v5 = vadd.f32 %v29_v3, %v27_v2  ;;  %v39_v6 = vmul.f32 %v38_v4, %v24_v0  ;;  %v41_v7 = vstv %s179_s17  ;;  %s288_s23 = sld [smem:[#allocation2 + $0x8]] }
  0x19   :  { %v50_v8 = vstv %s181_s0  ;;  %s290_s24 = sld [smem:[#allocation2 + $0x9]] }
  0x1a   :  { %v177_v9 = vmul.f32 -1.442695, %v30_v5  ;;  %v42_v10 = vadd.f32 %v41_v7, %v39_v6  ;;  %v51_v11 = vmul.f32 %v50_v8, %v24_v0  ;;  %v53_v12 = vstv %s182_s20  ;;  %s292_s25 = sld [smem:[#allocation2 + $0x16]] }
  0x1b   :  { %s294_s26 = sld [smem:[#allocation2 + $0xa]]  ;;  %v62_v22 = vstv %s282_s1 }
  0x1c   :  { %214 = vpow2.f32 %v177_v9  ;;  %v180_v13 = vmul.f32 -1.442695, %v42_v10  ;;  %v54_v14 = vadd.f32 %v53_v12, %v51_v11  ;;  %s296_s27 = sld [smem:[#allocation2 + $0xb]]  ;;  %v65_v23 = vstv %s284_s21 }
  0x1d   :  { %s298_s28 = sld [smem:[#allocation2 + $0xc]]  ;;  %v68_v24 = vstv %s286_s22 }
  0x1e   :  { %216 = vpow2.f32 %v180_v13  ;;  %v183_v15 = vmul.f32 -1.442695, %v54_v14  ;;  %s300_s29 = sld [smem:[#allocation2 + $0x17]]  ;;  %v72_v25 = vstv %s288_s23 }
  0x1f   :  { %s302_s30 = sld [smem:[#allocation2 + $0xd]]  ;;  %v84_v26 = vstv %s290_s24 }
  0x20   :  { %218 = vpow2.f32 %v183_v15  ;;  %s304_s3 = sld [smem:[#allocation2 + $0xe]]  ;;  %v87_v27 = vstv %s292_s25 }
  0x21   :  { %s306_s4 = sld [smem:[#allocation2 + $0xf]]  ;;  %v90_v28 = vstv %s294_s26 }
  0x22   :  { %s308_s5 = sld [smem:[#allocation2 + $0x18]]  ;;  %v94_v31 = vstv %s296_s27 }
  0x23   :  { %s310_s6 = sld [smem:[#allocation2 + $0x10]]  ;;  %v106_v29 = vstv %s298_s28 }
  0x24   :  { %s312_s7 = sld [smem:[#allocation2 + $0x11]]  ;;  %v109_v32 = vstv %s300_s29 }
  0x25   :  { %s207_s8 = sld [smem:[#allocation2 + $0x12]]  ;;  %v112_v33 = vstv %s302_s30 }
  0x26   :  { %s314_s9 = sld [smem:[#allocation2 + $0x19]]  ;;  %v116_v36 = vstv %s304_s3 }
  0x27   :  { %s316_s10 = sld [smem:[#allocation2 + $0x13]]  ;;  %v128_v30 = vstv %s306_s4 }
  0x28   :  { %s318_s11 = sld [smem:[#allocation2 + $0x14]]  ;;  %v131_v37 = vstv %s308_s5 }
  0x29   :  { %v215_v16 = vpop.eup %214  ;;  %v134_v38 = vstv %s310_s6 }
  0x2a   :  { %v34_v17 = vadd.f32 1.0, %v215_v16  ;;  %v138_v39 = vstv %s312_s7 }
  0x2b   :  { %v217_v18 = vpop.eup %216  ;;  %v150_v34 = vstv %s207_s8 }
  0x2c   :  { %220 = vrcp.f32 %v34_v17  ;;  %v46_v19 = vadd.f32 1.0, %v217_v18  ;;  %v153_v46 = vstv %s314_s9 }
  0x2d   :  { %v219_v20 = vpop.eup %218  ;;  %v156_v47 = vstv %s316_s10 }
  0x2e   :  { %222 = vrcp.f32 %v46_v19  ;;  %v58_v21 = vadd.f32 1.0, %v219_v20  ;;  %v160_v48 = vstv %s318_s11 }
  0x30   :  { %224 = vrcp.f32 %v58_v21 }
  0x39   :  { %v221_v35 = vpop.eup %220 }
  0x3a   :  { %v63_v40 = vmul.f32 %v221_v35, %v62_v22  ;;  %v85_v41 = vmul.f32 %v221_v35, %v84_v26  ;;  %v107_v42 = vmul.f32 %v221_v35, %v106_v29  ;;  %v129_v43 = vmul.f32 %v221_v35, %v128_v30 }
  0x3b   :  { %v223_v44 = vpop.eup %222  ;;  %v151_v45 = vmul.f32 %v221_v35, %v150_v34 }
  0x3c   :  { %v66_v49 = vadd.f32 %v65_v23, %v63_v40  ;;  %v69_v50 = vmul.f32 %v223_v44, %v68_v24  ;;  %v88_v51 = vadd.f32 %v87_v27, %v85_v41  ;;  %v91_v52 = vmul.f32 %v223_v44, %v90_v28 }
  0x3d   :  { %v225_v53 = vpop.eup %224  ;;  %v110_v54 = vadd.f32 %v109_v32, %v107_v42  ;;  %v113_v55 = vmul.f32 %v223_v44, %v112_v33  ;;  %v132_v56 = vadd.f32 %v131_v37, %v129_v43  ;;  %v135_v57 = vmul.f32 %v223_v44, %v134_v38 }
  0x3e   :  { %v70_v58 = vadd.f32 %v69_v50, %v66_v49  ;;  %v73_v59 = vmul.f32 %v225_v53, %v72_v25  ;;  %v92_v60 = vadd.f32 %v91_v52, %v88_v51  ;;  %v95_v61 = vmul.f32 %v225_v53, %v94_v31 }
  0x3f   :  { %v114_v62 = vadd.f32 %v113_v55, %v110_v54  ;;  %v117_v63 = vmul.f32 %v225_v53, %v116_v36  ;;  %v136_v0 = vadd.f32 %v135_v57, %v132_v56  ;;  %v139_v1 = vmul.f32 %v225_v53, %v138_v39 }
  0x40   :  { %v74_v2 = vadd.f32 %v73_v59, %v70_v58  ;;  %v96_v3 = vadd.f32 %v95_v61, %v92_v60  ;;  %v154_v4 = vadd.f32 %v153_v46, %v151_v45  ;;  %v157_v5 = vmul.f32 %v223_v44, %v156_v47 }
  0x41   :  { %v118_v6 = vadd.f32 %v117_v63, %v114_v62  ;;  %v140_v7 = vadd.f32 %v139_v1, %v136_v0  ;;  %v161_v8 = vmul.f32 %v225_v53, %v160_v48 }
  0x42   :  { %v188_v9 = vmul.f32 -1.442695, %v74_v2  ;;  %v193_v10 = vmul.f32 -1.442695, %v96_v3  ;;  %v158_v11 = vadd.f32 %v157_v5, %v154_v4 }
  0x43   :  { %v199_v12 = vmul.f32 -1.442695, %v118_v6  ;;  %v205_v13 = vmul.f32 -1.442695, %v140_v7 }
  0x44   :  { %226 = vpow2.f32 %v188_v9  ;;  %v162_v14 = vadd.f32 %v161_v8, %v158_v11 }
  0x45   :  { %228 = vpow2.f32 %v193_v10 }
  0x46   :  { %230 = vpow2.f32 %v199_v12  ;;  %v211_v15 = vmul.f32 -1.442695, %v162_v14 }
  0x47   :  { %232 = vpow2.f32 %v205_v13 }
  0x48   :  { %234 = vpow2.f32 %v211_v15 }
  0x51   :  { %v227_v16 = vpop.eup %226 }
  0x52   :  { %v229_v17 = vpop.eup %228  ;;  %v78_v18 = vadd.f32 1.0, %v227_v16 }
  0x53   :  { %v231_v19 = vpop.eup %230  ;;  %v100_v20 = vadd.f32 1.0, %v229_v17 }
  0x54   :  { %v233_v21 = vpop.eup %232  ;;  %236 = vrcp.f32 %v78_v18  ;;  %v122_v22 = vadd.f32 1.0, %v231_v19 }
  0x55   :  { %v235_v23 = vpop.eup %234  ;;  %238 = vrcp.f32 %v100_v20  ;;  %v144_v24 = vadd.f32 1.0, %v233_v21 }
  0x56   :  { %240 = vrcp.f32 %v122_v22  ;;  %v166_v25 = vadd.f32 1.0, %v235_v23 }
  0x57   :  { %242 = vrcp.f32 %v144_v24 }
  0x58   :  { %244 = vrcp.f32 %v166_v25 }
  0x61   :  { %v237_v26 = vpop.eup %236 }
  0x62   :  { %v239_v27 = vpop.eup %238  ;;  %82 = vst.msk [vmem:[%s356_s2] sm:$0xff] %vm81_vm0, %v237_v26 }
  0x63   :  { %v241_v28 = vpop.eup %240  ;;  %194 = vst.msk [vmem:[%s356_s2 + $0x8] sm:$0xff] %vm81_vm0, %v239_v27 }
  0x64   :  { %v243_v29 = vpop.eup %242  ;;  %200 = vst.msk [vmem:[%s356_s2 + $0x10] sm:$0xff] %vm81_vm0, %v241_v28 }
  0x65   :  { %v245_v30 = vpop.eup %244  ;;  %206 = vst.msk [vmem:[%s356_s2 + $0x18] sm:$0xff] %vm81_vm0, %v243_v29 }
  0x66   :  { %212 = vst.msk [vmem:[%s356_s2 + $0x20] sm:$0xff] %vm81_vm0, %v245_v30 }
  0x67   :  { %175 = vsyncpa [#allocation3], 1 }

</bundles_post_ra>
